<compile_context>
chip_gen: v7x
topology: tpu7x:2x2x1
jax: 0.10.0
libtpu: 0.0.40
codegen_flags: <defaults>
</compile_context>

<pallas_src>
import functools

import jax
import jax.numpy as jnp
from jax.experimental import pallas as pl
from jax.experimental.pallas import tpu as pltpu


def metric_model_kernel(x_ref, p_ref, o_ref, *, batch, hw, c_in, c_mid, proj):
    # x_ref: (B*C_in, HW)  -- free reshape of the NCHW input (no transpose).
    # p_ref: (C_mid+1, C_in+1+P) packed parameters:
    #          [:C_mid, :C_in]         = w1.T   (1x1-conv weight, transposed)
    #          [:C_mid,  C_in]         = b1     (conv bias)
    #          [:C_mid,  C_in+1:]      = w2     (head.fc weight, (C_mid, P))
    #          [ C_mid,  C_in+1:]      = b2     (head.fc bias)
    # o_ref: (B, P)
    w1t = p_ref[0:c_mid, 0:c_in]                              # (C_mid, C_in)
    b1 = p_ref[0:c_mid, c_in:c_in + 1]                        # (C_mid, 1)
    w2 = p_ref[0:c_mid, c_in + 1:c_in + 1 + proj]             # (C_mid, P)
    b2 = p_ref[c_mid:c_mid + 1, c_in + 1:c_in + 1 + proj]     # (1, P)

    # 1x1 conv (channel contraction) + bias + ReLU, one small MXU dot per
    # image.  B is tiny and static, so the loop is fully unrolled.
    h_parts = []
    for b in range(batch):
        x_b = x_ref[b * c_in:(b + 1) * c_in, :]               # (C_in, HW)
        h_b = jnp.dot(w1t, x_b, preferred_element_type=jnp.float32) + b1
        h_parts.append(jnp.maximum(h_b, 0.0))                 # (C_mid, HW)
    h = jnp.concatenate(h_parts, axis=0)                      # (B*C_mid, HW)

    # Global average pool for the whole batch in ONE lane-axis reduction.
    # (B*C_mid, HW) -> (B, C_mid, HW) is a free tile re-index (C_mid % 8 == 0).
    pooled = jnp.sum(h.reshape(batch, c_mid, hw), axis=-1) * (1.0 / hw)  # (B, C_mid)

    # head.fc projection for all B rows at once; single (B, P) masked store.
    out = jnp.dot(pooled, w2, preferred_element_type=jnp.float32) + b2   # (B, P)
    o_ref[...] = out.astype(o_ref.dtype)


def pack_params(w1, b1, w2, b2):
    """One-time parameter packing into a single VMEM slab (done at init,
    hoisted out of the per-forward path)."""
    c_in, c_mid = w1.shape
    proj = w2.shape[1]
    slab = jnp.zeros((c_mid + 1, c_in + 1 + proj), dtype=jnp.float32)
    slab = slab.at[:c_mid, :c_in].set(w1.T)
    slab = slab.at[:c_mid, c_in].set(b1)
    slab = slab.at[:c_mid, c_in + 1:].set(w2)
    slab = slab.at[c_mid, c_in + 1:].set(b2)
    return slab


def metric_model_forward(x_nchw, params, *, c_mid, proj):
    """x_nchw: [B, C_in, H, W] float32, params: packed slab -> embeddings [B, P]."""
    B, C_in, H, W = x_nchw.shape
    HW = H * W
    assert params.shape == (c_mid + 1, C_in + 1 + proj), params.shape

    # Free, contiguous reshape — no transpose, no extra HBM round trip.
    x_flat = x_nchw.reshape(B * C_in, HW)

    kernel = functools.partial(metric_model_kernel, batch=B, hw=HW,
                               c_in=C_in, c_mid=c_mid, proj=proj)

    out = pl.pallas_call(
        kernel,
        out_shape=jax.ShapeDtypeStruct((B, proj), jnp.float32),
        grid=(1,),  # whole batch in one invocation; everything fits in VMEM
        in_specs=[
            pl.BlockSpec((B * C_in, HW), lambda i: (0, 0)),
            pl.BlockSpec((c_mid + 1, C_in + 1 + proj), lambda i: (0, 0)),
        ],
        out_specs=pl.BlockSpec((B, proj), lambda i: (0, 0)),
        compiler_params=pltpu.CompilerParams(
            dimension_semantics=("arbitrary",)),
    )(x_flat, params)

    # embeddings = features.view(B, -1); output is already (B, P).
    return out


def metric_model_reference(x_nchw, w1, b1, w2, b2):
    """Pure-JAX reference matching the PyTorch semantics."""
    B, C_in, H, W = x_nchw.shape
    x = jnp.transpose(x_nchw, (0, 2, 3, 1)).reshape(B, H * W, C_in)
    h = jnp.maximum(jnp.einsum("bnc,cm->bnm", x, w1) + b1, 0.0)
    pooled = jnp.mean(h, axis=1)                     # (B, C_mid)
    feats = pooled @ w2 + b2                         # (B, P) — base_model output
    return feats.reshape(feats.shape[0], -1)         # embeddings = view(B, -1)


if __name__ == "__main__":
    # Small shapes consistent with the module:
    #   x: [2, 4, 16, 16], projection_in_dim = 32, projection_out_dim = 8
    B, C_in, H, W = 2, 4, 16, 16
    C_mid = 32   # projection_in_dim (backbone feature width)
    P = 8        # projection_out_dim

    key = jax.random.PRNGKey(0)
    kx, k1, kb1, k2, kb2 = jax.random.split(key, 5)

    x = jax.random.normal(kx, (B, C_in, H, W), dtype=jnp.float32)
    # Deterministic synthetic parameters (no checkpoint load).
    w1 = 0.1 * jax.random.normal(k1, (C_in, C_mid), dtype=jnp.float32)
    b1 = 0.01 * jax.random.normal(kb1, (C_mid,), dtype=jnp.float32)
    w2 = 0.1 * jax.random.normal(k2, (C_mid, P), dtype=jnp.float32)   # head.fc weight^T
    b2 = 0.01 * jax.random.normal(kb2, (P,), dtype=jnp.float32)       # head.fc bias

    # One-time parameter packing (init-time, not part of the forward path).
    params = jax.block_until_ready(pack_params(w1, b1, w2, b2))

    out = metric_model_forward(x, params, c_mid=C_mid, proj=P)
    out = jax.block_until_ready(out)

    ref = metric_model_reference(x, w1, b1, w2, b2)
    assert out.shape == (B, P), out.shape
    assert jnp.allclose(out, ref, atol=1e-5, rtol=1e-5), (
        f"max abs err {jnp.max(jnp.abs(out - ref))}")

    print("KERNEL_OK")
</pallas_src>

<mosaic_0001>
module attributes {stable_mosaic.version = 11 : i64} {
  func.func @metric_model_kernel(%arg0: i32, %arg1: memref<8x256xf32, #tpu.memory_space<vmem>>, %arg2: memref<33x13xf32, #tpu.memory_space<vmem>>, %arg3: memref<2x8xf32, #tpu.memory_space<vmem>>) attributes {dimension_semantics = [#tpu.dimension_semantics<arbitrary>], iteration_bounds = array<i64: 1>, scalar_prefetch = 0 : i64, scratch_operands = 0 : i64, tpu.core_type = #tpu.core_type<tc>, window_params = [{pipeline_mode = #tpu.pipeline_mode<synchronous>, transform_indices = @transform_0, window_bounds = array<i64: 8, 256>}, {pipeline_mode = #tpu.pipeline_mode<synchronous>, transform_indices = @transform_1, window_bounds = array<i64: 33, 13>}, {pipeline_mode = #tpu.pipeline_mode<synchronous>, transform_indices = @transform_2, window_bounds = array<i64: 2, 8>}]} {
    %c0 = arith.constant 0 : index
    %c0_0 = arith.constant 0 : index
    %0 = vector.load %arg2[%c0, %c0_0] : memref<33x13xf32, #tpu.memory_space<vmem>>, vector<32x4xf32>
    %c0_1 = arith.constant 0 : index
    %c4 = arith.constant 4 : index
    %1 = vector.load %arg2[%c0_1, %c4] : memref<33x13xf32, #tpu.memory_space<vmem>>, vector<32x1xf32>
    %c0_2 = arith.constant 0 : index
    %c5 = arith.constant 5 : index
    %2 = vector.load %arg2[%c0_2, %c5] : memref<33x13xf32, #tpu.memory_space<vmem>>, vector<32x8xf32>
    %c32 = arith.constant 32 : index
    %c5_3 = arith.constant 5 : index
    %3 = vector.load %arg2[%c32, %c5_3] : memref<33x13xf32, #tpu.memory_space<vmem>>, vector<1x8xf32>
    %c0_4 = arith.constant 0 : index
    %c0_5 = arith.constant 0 : index
    %4 = vector.load %arg1[%c0_4, %c0_5] : memref<8x256xf32, #tpu.memory_space<vmem>>, vector<4x256xf32>
    %cst = arith.constant dense<0.000000e+00> : vector<32x256xf32>
    %5 = tpu.matmul %0, %4, %cst {dimension_numbers = #tpu.dot_dimension_numbers<[1], [0], [0], [1], [0, 0, 1, 1], [], []>} : vector<32x4xf32>, vector<4x256xf32>, vector<32x256xf32> -> vector<32x256xf32>
    %6 = vector.broadcast %1 : vector<32x1xf32> to vector<32x256xf32>
    %7 = arith.addf %5, %6 : vector<32x256xf32>
    %cst_6 = arith.constant 0.000000e+00 : f32
    %8 = vector.broadcast %cst_6 : f32 to vector<32x256xf32>
    %9 = arith.maximumf %7, %8 : vector<32x256xf32>
    %c4_7 = arith.constant 4 : index
    %c0_8 = arith.constant 0 : index
    %10 = vector.load %arg1[%c4_7, %c0_8] : memref<8x256xf32, #tpu.memory_space<vmem>>, vector<4x256xf32>
    %cst_9 = arith.constant dense<0.000000e+00> : vector<32x256xf32>
    %11 = tpu.matmul %0, %10, %cst_9 {dimension_numbers = #tpu.dot_dimension_numbers<[1], [0], [0], [1], [0, 0, 1, 1], [], []>} : vector<32x4xf32>, vector<4x256xf32>, vector<32x256xf32> -> vector<32x256xf32>
    %12 = vector.broadcast %1 : vector<32x1xf32> to vector<32x256xf32>
    %13 = arith.addf %11, %12 : vector<32x256xf32>
    %cst_10 = arith.constant 0.000000e+00 : f32
    %14 = vector.broadcast %cst_10 : f32 to vector<32x256xf32>
    %15 = arith.maximumf %13, %14 : vector<32x256xf32>
    %16 = tpu.concatenate %9, %15 in 0 : vector<32x256xf32>, vector<32x256xf32> -> vector<64x256xf32>
    %17 = vector.shape_cast %16 : vector<64x256xf32> to vector<2x32x256xf32>
    %cst_11 = arith.constant dense<0.000000e+00> : vector<2x32xf32>
    %18 = vector.multi_reduction <add>, %17, %cst_11 [2] : vector<2x32x256xf32> to vector<2x32xf32>
    %cst_12 = arith.constant 3.906250e-03 : f32
    %19 = vector.broadcast %cst_12 : f32 to vector<2x32xf32>
    %20 = arith.mulf %18, %19 : vector<2x32xf32>
    %cst_13 = arith.constant dense<0.000000e+00> : vector<2x8xf32>
    %21 = tpu.matmul %20, %2, %cst_13 {dimension_numbers = #tpu.dot_dimension_numbers<[1], [0], [0], [1], [0, 0, 1, 1], [], []>} : vector<2x32xf32>, vector<32x8xf32>, vector<2x8xf32> -> vector<2x8xf32>
    %22 = vector.broadcast %3 : vector<1x8xf32> to vector<2x8xf32>
    %23 = arith.addf %21, %22 : vector<2x8xf32>
    %c0_14 = arith.constant 0 : index
    %c0_15 = arith.constant 0 : index
    %24 = vector.load %arg3[%c0_14, %c0_15] : memref<2x8xf32, #tpu.memory_space<vmem>>, vector<2x8xf32>
    tpu.vector_store %arg3[%c0_14, %c0_15], %23 {strides = array<i32>} : memref<2x8xf32, #tpu.memory_space<vmem>>, vector<2x8xf32>,
    return
  }
  func.func @transform_0(%arg0: i32) -> (i32, i32) {
    %c0_i32 = arith.constant 0 : i32
    %c0_i32_0 = arith.constant 0 : i32
    %c0_i32_1 = arith.constant 0 : i32
    return %c0_i32, %c0_i32_0 : i32, i32
  }
  func.func @transform_1(%arg0: i32) -> (i32, i32) {
    %c0_i32 = arith.constant 0 : i32
    %c0_i32_0 = arith.constant 0 : i32
    %c0_i32_1 = arith.constant 0 : i32
    return %c0_i32, %c0_i32_0 : i32, i32
  }
  func.func @transform_2(%arg0: i32) -> (i32, i32) {
    %c0_i32 = arith.constant 0 : i32
    %c0_i32_0 = arith.constant 0 : i32
    %c0_i32_1 = arith.constant 0 : i32
    return %c0_i32, %c0_i32_0 : i32, i32
  }
}

</mosaic_0001>

<bundles_post_ra>
// kernel: tpu_custom_call.1
= control target key start
LH: loop header
LB: loop body
LE: loop exit
PB: predicated region body
PF: predicated region fallthrough
CT: control target
= control target key end

     0   :  { %vm48_vm0 = vcmask 1043456   ;;  %v534_v2 = vmov 0.0   ;;  %vm39_vm1 = vcmask 31744   ;;  %v535_v8 = vmov 4   ;;  %s639_s0 = inlined_call_operand.vmem [shape: f32[8,256], index: 0, kind: input, shape index: {}]   ;;  %s640_s1 = inlined_call_operand.vmem [shape: f32[33,13], index: 1, kind: input, shape index: {}]   ;;  %s641_s2 = inlined_call_operand.hbm [shape: f32[2,8], index: 2, kind: output, shape index: {}]  }
   0x1   :  { %v18_v0 = vld [vmem:[%s639_s0 + $0x8] sm:$0xf]  ;;  %v17_v1 = vld [vmem:[%s639_s0] sm:$0xf]  ;;  %119 = vmatprep.mubr.f32.mxu0 %v534_v2  ;;  %v153_v4 = vld [vmem:[%s639_s0 + $0x8] sm:$0xf0]  ;;  %226 = vmatprep.mubr.f32.mxu1 %v534_v2 }
   0x2   :  { %456 = vmatprep.subr.msk.mxu0 %vm48_vm0, %v18_v0  ;;  %v566_v3 = vld [vmem:[%s640_s1] sm:$0xff]  ;;  %v157_v6 = vrot.slane %v153_v4, 4  ;;  %498 = vset.pattern.permute.xlu0 %v535_v8 }
   0x3   :  { %v152_v5 = vld [vmem:[%s639_s0] sm:$0xf0]  ;;  %457 = vmatpush1.msk.msra.mxu0 %vm48_vm0, %v17_v1 }
   0x4   :  { %v156_v7 = vrot.slane %v152_v5, 4  ;;  %458 = vmatmul.mubr.msk.f32.vlgmr.msra.gmra.mrb[0].mxu0 %vm39_vm1, %v566_v3 }
   0x5   :  { %7 = vsyncpa [#allocation3], 0  ;;  %462 = vmatprep.subr.msk.mxu1 %vm48_vm0, %v157_v6  ;;  %125 = vmatprep.mubr.f32.mxu0 %v534_v2  ;;  %v583_v9 = vld [vmem:[%s640_s1 + $0x8] sm:$0xff]  ;;  %v595_v10 = vld [vmem:[%s640_s1 + $0x10] sm:$0xff]  ;;  %s536_s24 = smov 123   ;;  %vm538_vm2 = vmmov 0  }
   0x6   :  { %463 = vmatpush1.msk.msra.mxu1 %vm48_vm0, %v156_v7  ;;  %21 = vperm.xlu0 %498, %v566_v3   ;;  %v608_v11 = vld [vmem:[%s640_s1 + $0x18] sm:$0xff]  ;;  %vm314_vm3 = vcmask 130112   ;;  %vm321_vm4 = vcmask 195712   ;;  %vm328_vm5 = vcmask 261312   ;;  %vm349_vm6 = vcmask 1041409  }
   0x7   :  { %464 = vmatmul.mubr.msk.f32.vlgmr.msra.gmra.mrb[0].mxu1 %vm39_vm1, %v566_v3  ;;  %499 = vset.pattern.permute.xlu1 %v535_v8  ;;  %vm367_vm7 = vcmask 261120   ;;  %vm440_vm8 = vcmask 58368  }
   0x8   :  { %459 = vmatmul.mubr.msk.f32.gmra.mrb[2].mxu0 %vm39_vm1, %v583_v9  ;;  %232 = vmatprep.mubr.f32.mxu1 %v534_v2 }
   0x9   :  { %131 = vmatprep.mubr.f32.mxu0 %v534_v2  ;;  %31 = vperm.xlu1 %499, %v595_v10  }
   0xa   :  { %26 = vperm.xlu0 %498, %v583_v9  }
   0xb   :  { %465 = vmatmul.mubr.msk.f32.gmra.mrb[2].mxu1 %vm39_vm1, %v583_v9 }
   0xc   :  { %460 = vmatmul.mubr.msk.f32.gmra.mrb[4].mxu0 %vm39_vm1, %v595_v10  ;;  %238 = vmatprep.mubr.f32.mxu1 %v534_v2 }
   0xd   :  { %137 = vmatprep.mubr.f32.mxu0 %v534_v2  ;;  %36 = vperm.xlu1 %499, %v608_v11  }
   0xf   :  { %466 = vmatmul.mubr.msk.f32.gmra.mrb[4].mxu1 %vm39_vm1, %v595_v10 }
  0x10   :  { %461 = vmatmul.mubr.msk.f32.gmra.mrb[6].mxu0 %vm39_vm1, %v608_v11  ;;  %244 = vmatprep.mubr.f32.mxu1 %v534_v2 }
  0x11   :  { %483 = vmatprep.mubr.msk.f32.mxu0 %vm538_vm2, %v534_v2 }
  0x13   :  { %467 = vmatmul.mubr.msk.f32.gmra.mrb[6].mxu1 %vm39_vm1, %v608_v11 }
  0x85   :  { %v22_v12 = vpop.permute.xlu0 %21 }
  0x88   :  { %v32_v26 = vpop.permute.xlu1 %31 }
  0x89   :  { %v27_v18 = vpop.permute.xlu0 %26 }
  0x8c   :  { %v37_v47 = vpop.permute.xlu1 %36 }
  0xd7   :  { %v121_v13 = vpop.f32.mrb[0].mxu0 }
  0xd8   :  { %v122_v14 = vadd.f32 %v121_v13, %v22_v12  ;;  %v123_v15 = vpop.f32.mrb[1].mxu0  ;;  %v500_v13 = vpack.i.bf16 %v583_v9, %v566_v3  ;;  %v303_v3 = vlaneseq }
  0xd9   :  { %v124_v16 = vadd.f32 %v123_v15, %v22_v12  ;;  %v537_v15 = vmov 0.0|0.0  }
  0xda   :  { %v144_v17 = vmax.f32 %v122_v14, 0.0  ;;  %v228_v19 = vpop.f32.mrb[0].mxu1  ;;  %v505_v14 = vpack.i.bf16 %v608_v11, %v595_v10  ;;  %486 = vmatprep.subr.bf16.mxu0 %v537_v15 }
  0xdb   :  { %v145_v20 = vmax.f32 %v124_v16, 0.0  ;;  %v229_v21 = vadd.f32 %v228_v19, %v22_v12  ;;  %v230_v22 = vpop.f32.mrb[1].mxu1  ;;  %v127_v23 = vpop.f32.mrb[2].mxu0  ;;  %v468_v16 = vld [vmem:[%s640_s1 + $0x20] ss:$0 sm:$0xff]  ;;  %s539_s1 = smov [#allocation2]  }
  0xdc   :  { %v231_v24 = vadd.f32 %v230_v22, %v22_v12  ;;  %v128_v25 = vadd.f32 %v127_v23, %v27_v18  ;;  %v129_v27 = vpop.f32.mrb[3].mxu0  ;;  %v306_v22 = vshrl.u32 %v303_v3, 7  ;;  %s448_s27 = sshll.u32 %s539_s1, 4  ;;  %s449_s27 = int_to_ptr.vmem [resolvable:$true] %s448_s27 }
  0xdd   :  { %v251_v28 = vmax.f32 %v229_v21, 0.0  ;;  %v130_v29 = vadd.f32 %v129_v27, %v27_v18  ;;  %v259_v30 = vadd.f32 %v145_v20, %v144_v17  ;;  %v304_v21 = vand.u32 127, %v303_v3  ;;  %s510_s28 = scalar_lea.vmem %s449_s27, 32  ;;  %p515_p1 = scmp.lt.s32.totalorder %s449_s27, %s449_s27 }
  0xde   :  { %v252_v31 = vmax.f32 %v231_v24, 0.0  ;;  %v146_v32 = vmax.f32 %v128_v25, 0.0  ;;  %v234_v33 = vpop.f32.mrb[2].mxu1  ;;  %p511_p0 = scmp.ne.s32.totalorder %s449_s27, %s510_s28  ;;  %p516_p2 = scmp.lt.s32.totalorder %s510_s28, %s510_s28 }
  0xdf   :  { %v147_v34 = vmax.f32 %v130_v29, 0.0  ;;  %v235_v35 = vadd.f32 %v234_v33, %v27_v18  ;;  %v236_v36 = vpop.f32.mrb[3].mxu1  ;;  %v133_v37 = vpop.f32.mrb[4].mxu0  ;;  %260 = vadd.xlane.f32.xlu0 %v259_v30  ;;  %v309_v10 = vadd.s32 4294967288, %v304_v21  ;;  %v316_v11 = vadd.s32 4294967280, %v304_v21 }
  0xe0   :  { %v237_v38 = vadd.f32 %v236_v36, %v27_v18  ;;  %v134_v39 = vadd.f32 %v133_v37, %v32_v26  ;;  %v135_v40 = vpop.f32.mrb[5].mxu0  ;;  %v271_v41 = vadd.f32 %v252_v31, %v251_v28  ;;  %v323_v25 = vadd.s32 4294967272, %v304_v21  ;;  %p517_p3 = por %p516_p2, %p515_p1 }
  0xe1   :  { %v253_v42 = vmax.f32 %v235_v35, 0.0  ;;  %v136_v43 = vadd.f32 %v135_v40, %v32_v26  ;;  %v262_v44 = vadd.f32 %v147_v34, %v146_v32  ;;  %v307_v2 = vsub.s32 %v304_v21, %v306_v22 }
  0xe2   :  { %v254_v45 = vmax.f32 %v237_v38, 0.0  ;;  %v148_v46 = vmax.f32 %v134_v39, 0.0  ;;  %v240_v48 = vpop.f32.mrb[4].mxu1  ;;  %v312_v28 = vsub.s32 %v309_v10, %v306_v22  ;;  %v319_v31 = vsub.s32 %v316_v11, %v306_v22  ;;  %p518_p4 = pnand %p517_p3, %p511_p0 }
  0xe3   :  { %v149_v49 = vmax.f32 %v136_v43, 0.0  ;;  %v241_v50 = vadd.f32 %v240_v48, %v32_v26  ;;  %v242_v51 = vpop.f32.mrb[5].mxu1  ;;  %v139_v52 = vpop.f32.mrb[6].mxu0  ;;  %263 = vadd.xlane.f32.xlu1 %v262_v44  ;;  %272 = vadd.xlane.f32.xlu0 %v271_v41  ;;  %v326_v35 = vsub.s32 %v323_v25, %v306_v22 }
  0xe4   :  { %v243_v53 = vadd.f32 %v242_v51, %v32_v26  ;;  %v140_v54 = vadd.f32 %v139_v52, %v37_v47  ;;  %v141_v55 = vpop.f32.mrb[7].mxu0  ;;  %v274_v56 = vadd.f32 %v254_v45, %v253_v42 }
  0xe5   :  { %v255_v57 = vmax.f32 %v241_v50, 0.0  ;;  %v142_v58 = vadd.f32 %v141_v55, %v37_v47  ;;  %v265_v59 = vadd.f32 %v149_v49, %v148_v46 }
  0xe6   :  { %v256_v60 = vmax.f32 %v243_v53, 0.0  ;;  %v150_v61 = vmax.f32 %v140_v54, 0.0  ;;  %v246_v62 = vpop.f32.mrb[6].mxu1 }
  0xe7   :  { %v151_v63 = vmax.f32 %v142_v58, 0.0  ;;  %v247_v0 = vadd.f32 %v246_v62, %v37_v47  ;;  %v248_v1 = vpop.f32.mrb[7].mxu1  ;;  %266 = vadd.xlane.f32.xlu1 %v265_v59  ;;  %275 = vadd.xlane.f32.xlu0 %v274_v56 }
  0xe8   :  { %v249_v4 = vadd.f32 %v248_v1, %v37_v47  ;;  %v277_v5 = vadd.f32 %v256_v60, %v255_v57 }
  0xe9   :  { %v257_v6 = vmax.f32 %v247_v0, 0.0  ;;  %v268_v7 = vadd.f32 %v151_v63, %v150_v61 }
  0xea   :  { %v258_v8 = vmax.f32 %v249_v4, 0.0 }
  0xeb   :  { %269 = vadd.xlane.f32.xlu1 %v268_v7  ;;  %278 = vadd.xlane.f32.xlu0 %v277_v5 }
  0xec   :  { %v280_v12 = vadd.f32 %v258_v8, %v257_v6 }
  0xef   :  { %281 = vadd.xlane.f32.xlu0 %v280_v12 }
  0xfc   :  { %501 = vrot.lane.b32.xlu1 %v500_v13, %s536_s24 }
 0x100   :  { %364 = vrot.lane.b32.xlu1 %v468_v16, %s536_s24 }
 0x105   :  { %506 = vrot.lane.b32.xlu0 %v505_v14, %s536_s24 }
 0x16c   :  { %v261_v17 = vpop.xlane.xlu0 %260 }
 0x16d   :  { %v283_v38 = vmul.f32 0.00390625, %v261_v17 }
 0x16f   :  { %v308_v51 = vrot.slane %v283_v38, %v307_v2 }
 0x170   :  { %v264_v18 = vpop.xlane.xlu1 %263  ;;  %v273_v19 = vpop.xlane.xlu0 %272 }
 0x171   :  { %v284_v29 = vmul.f32 0.00390625, %v264_v18  ;;  %v287_v30 = vmul.f32 0.00390625, %v273_v19 }
 0x173   :  { %v313_v44 = vrot.slane %v284_v29, %v312_v28  ;;  %v333_v45 = vrot.slane %v287_v30, %v307_v2 }
 0x174   :  { %v267_v9 = vpop.xlane.xlu1 %266  ;;  %v276_v20 = vpop.xlane.xlu0 %275 }
 0x175   :  { %v288_v26 = vmul.f32 0.00390625, %v276_v20  ;;  %v285_v34 = vmul.f32 0.00390625, %v267_v9  ;;  %v315_v56 = vsel %vm314_vm3, %v313_v44, %v308_v51 }
 0x177   :  { %v337_v39 = vrot.slane %v288_v26, %v312_v28  ;;  %v320_v48 = vrot.slane %v285_v34, %v319_v31 }
 0x178   :  { %v270_v23 = vpop.xlane.xlu1 %269  ;;  %v279_v24 = vpop.xlane.xlu0 %278 }
 0x179   :  { %v289_v27 = vmul.f32 0.00390625, %v279_v24  ;;  %v286_v40 = vmul.f32 0.00390625, %v270_v23  ;;  %v338_v52 = vsel %vm314_vm3, %v337_v39, %v333_v45  ;;  %v322_v58 = vsel %vm321_vm4, %v320_v48, %v315_v56 }
 0x17b   :  { %v342_v42 = vrot.slane %v289_v27, %v319_v31  ;;  %v327_v53 = vrot.slane %v286_v40, %v326_v35 }
 0x17c   :  { %v502_v32 = vpop.permute.xlu1 %501  ;;  %v282_v33 = vpop.xlane.xlu0 %281 }
 0x17d   :  { %v504_v36 = vunpack.i.h.bf16 %v502_v32  ;;  %v503_v37 = vunpack.i.l.bf16 %v502_v32  ;;  %v290_v41 = vmul.f32 0.00390625, %v282_v33  ;;  %v343_v54 = vsel %vm321_vm4, %v342_v42, %v338_v52 }
 0x17e   :  { %v329_v59 = vsel %vm328_vm5, %v327_v53, %v322_v58 }
 0x17f   :  { %v487_v43 = vpack.c.bf16 %v504_v36, %v503_v37  ;;  %v347_v46 = vrot.slane %v290_v41, %v326_v35 }
 0x180   :  { %v507_v47 = vpop.permute.xlu0 %506  ;;  %v365_v61 = vpop.permute.xlu1 %364 }
 0x181   :  { %v509_v49 = vunpack.i.h.bf16 %v507_v47  ;;  %v508_v50 = vunpack.i.l.bf16 %v507_v47  ;;  %488 = vmatpush3.bf16.msra.mxu0 %v487_v43  ;;  %v348_v57 = vsel %vm328_vm5, %v347_v46, %v343_v54 }
 0x182   :  { %489 = vmatprep.subr.bf16.mxu0 %v537_v15  ;;  %v350_v60 = vsel %vm349_vm6, %v348_v57, %v329_v59 }
 0x183   :  { %v490_v55 = vpack.c.bf16 %v509_v49, %v508_v50 }
 0x185   :  { %491 = vmatpush3.bf16.msra.mxu0 %v490_v55 }
 0x188   :  { %484 = vmatmul.mubr.msk.f32.vlgmr.msra.gmra.mrb[8].mxu0 %vm367_vm7, %v350_v60 }
 0x25b   :  { %v436_v62 = vpop.f32.mrb[8].mxu0 }
 0x25c   :  { %v437_v63 = vadd.f32 %v436_v62, %v365_v61  ;;  %v485_v0 = vpop.f32.mrb[9].mxu0 }
 0x25e   :  { %441 = vst.msk [vmem:[#allocation2] sm:$0x3] %vm440_vm8, %v437_v63 }
 0x25f   :  { %521 = shalt.err (!%p518_p4)
}
 0x260   :  { %s522_s3 = scalar_lea.hbm %s641_s2, 32 }
 0x261   :  { %p523_p5 = scmp.ne.s32.totalorder %s641_s2, %s522_s3  ;;  %p526_p6 = scmp.lt.u32.totalorder %s522_s3, %s641_s2 }
 0x263   :  { %p528_p7 = pnand %p526_p6, %p523_p5 }
 0x265   :  { %531 = shalt.err (!%p528_p7)
}
 0x266   :  { %451 = dma.vmem_to_hbm [thread:$0]  %s449_s27, 32, %s641_s2, [#allocation3]  }
 0x267   :  { %532 = dma.done.wait [#allocation3], 32  }
 0x268   :  { %533 = vsyncadd [#allocation3], 4294967264 }
 0x269   :  { %455 = vsyncpa [#allocation3], 1 }

</bundles_post_ra>
